<compile_context>
chip_gen: v7x
topology: tpu7x:2x2x1
jax: 0.10.0
libtpu: 0.0.40
codegen_flags: <defaults>
</compile_context>

<pallas_src>
import math

import jax
import jax.numpy as jnp
from jax.experimental import pallas as pl
from jax.experimental.pallas import tpu as pltpu


def _round_up(x, m):
    return (x + m - 1) // m * m


# ---------------------------------------------------------------------------
# Kernels
# ---------------------------------------------------------------------------
def _noisy_linear_train_kernel(x_ref, w_mu_ref, w_sig_ref, eps_in_ref,
                               eps_out_ref, b_mu_ref, b_sig_ref, o_ref):
    # y = x @ w_mu + eps_out * ((x * eps_in) @ w_sigma) + (b_mu + b_sigma * eps_out)
    # Weights arrive as pre-transposed [IN, TN] tiles (bf16 by default) so the
    # MXU consumes them straight out of the pipelined DMA buffers.
    x32 = x_ref[...]                                          # [B, IN] f32
    eps_out = eps_out_ref[...]                                # [1, TN] f32

    y = jnp.dot(x32.astype(w_mu_ref.dtype), w_mu_ref[...],
                preferred_element_type=jnp.float32)           # [B, TN] f32
    x_noise = (x32 * eps_in_ref[...]).astype(w_sig_ref.dtype)
    y += eps_out * jnp.dot(x_noise, w_sig_ref[...],
                           preferred_element_type=jnp.float32)
    y += b_mu_ref[...] + b_sig_ref[...] * eps_out
    o_ref[...] = y.astype(o_ref.dtype)


def _noisy_linear_eval_kernel(x_ref, w_mu_ref, b_mu_ref, o_ref):
    # Eval mode: mu-only path, no sigma / epsilon traffic at all.
    y = jnp.dot(x_ref[...].astype(w_mu_ref.dtype), w_mu_ref[...],
                preferred_element_type=jnp.float32)
    o_ref[...] = (y + b_mu_ref[...]).astype(o_ref.dtype)


# ---------------------------------------------------------------------------
# Wrapper
# ---------------------------------------------------------------------------
def _choose_tn(out_pad, in_features, wbytes):
    """Pick the OUT tile width (multiple of 128).

    Prefer >= 2 (even) grid steps so v7x can shard the "parallel" OUT axis
    across its two TensorCores, while keeping the double-buffered weight
    stream (2 tensors x 2 buffers x TN x IN) inside the v5e 16 MiB scoped
    VMEM default.
    """
    budget = 8 * 1024 * 1024
    for tn in (512, 256, 128):
        steps = out_pad // tn
        if (out_pad % tn == 0 and steps >= 2 and steps % 2 == 0
                and 4 * tn * in_features * wbytes <= budget):
            return tn
    return 128


def noisy_linear_forward(x, params, training=True):
    """Pallas forward for NoisyLinear.

    x: [B, in_features] float32.
    params: dict from init_noisy_linear (weights pre-padded to a lane multiple,
            pre-transposed to [IN, OUT_pad], bf16 by default; factorized noise).
    """
    B, IN = x.shape
    OUT = params["out_features"]
    w_mu = params["weight_mu_t"]                    # [IN, OUT_pad]
    assert w_mu.shape[0] == IN
    OUT_pad = w_mu.shape[1]

    wbytes = w_mu.dtype.itemsize
    TN = _choose_tn(OUT_pad, IN, wbytes)
    grid = (OUT_pad // TN,)

    x_spec = pl.BlockSpec((B, IN), lambda j: (0, 0))          # resident LHS
    w_spec = pl.BlockSpec((IN, TN), lambda j: (0, j))         # streamed weights
    in_row_spec = pl.BlockSpec((1, IN), lambda j: (0, 0))     # eps_in row
    out_row_spec = pl.BlockSpec((1, TN), lambda j: (0, j))    # bias / eps_out rows
    out_spec = pl.BlockSpec((B, TN), lambda j: (0, j))        # lane-dense output
    out_shape = jax.ShapeDtypeStruct((B, OUT_pad), x.dtype)

    n_w = 2 if training else 1
    est = (2 * n_w * IN * TN * wbytes          # double-buffered weight tiles
           + 2 * (B * IN + B * TN) * 4         # x block + output block
           + 8 * (IN + TN) * 4)                # eps / bias rows
    vmem_limit = int(min(max(2 * est, 32 * 1024 * 1024), 64 * 1024 * 1024))
    cparams = pltpu.CompilerParams(dimension_semantics=("parallel",),
                                   vmem_limit_bytes=vmem_limit)

    if training:
        yp = pl.pallas_call(
            _noisy_linear_train_kernel,
            out_shape=out_shape,
            grid_spec=pl.GridSpec(
                grid=grid,
                in_specs=[x_spec, w_spec, w_spec, in_row_spec, out_row_spec,
                          out_row_spec, out_row_spec],
                out_specs=out_spec),
            compiler_params=cparams,
        )(x, w_mu, params["weight_sigma_t"], params["eps_in"],
          params["eps_out"], params["bias_mu"], params["bias_sigma"])
    else:
        yp = pl.pallas_call(
            _noisy_linear_eval_kernel,
            out_shape=out_shape,
            grid_spec=pl.GridSpec(
                grid=grid,
                in_specs=[x_spec, w_spec, out_row_spec],
                out_specs=out_spec),
            compiler_params=cparams,
        )(x, w_mu, params["bias_mu"])

    return yp if OUT_pad == OUT else yp[:, :OUT]


# ---------------------------------------------------------------------------
# Init / noise (torch reset_parameters / reset_noise equivalents)
# ---------------------------------------------------------------------------
def _scale_noise(key, size):
    # torch: x = randn(size); x.sign() * x.abs().sqrt()
    x = jax.random.normal(key, (size,), dtype=jnp.float32)
    return jnp.sign(x) * jnp.sqrt(jnp.abs(x))


def reset_noise(key, params):
    """Re-draw the factorized noise (weight_epsilon == eps_out ⊗ eps_in,
    bias_epsilon == eps_out; only the factors are stored)."""
    k_in, k_out = jax.random.split(key)
    in_f = params["in_features"]
    out_f = params["out_features"]
    out_pad = params["weight_mu_t"].shape[1]
    eps_in = _scale_noise(k_in, in_f).reshape(1, in_f)
    eps_out = jnp.zeros((1, out_pad), jnp.float32)
    eps_out = eps_out.at[0, :out_f].set(_scale_noise(k_out, out_f))
    return dict(params, eps_in=eps_in, eps_out=eps_out)


def init_noisy_linear(key, in_features, out_features, std_init=0.4,
                      weight_dtype=jnp.bfloat16):
    """Initialize NoisyLinear params in the kernel's preferred layout.

    Weights are padded along OUT to a multiple of 128, transposed to
    [IN, OUT_pad] and cast to `weight_dtype` ONCE here, so the per-call
    wrapper does no padding / transposition / HBM weight copies.
    """
    k_wmu, k_bmu, k_noise = jax.random.split(key, 3)
    out_pad = _round_up(out_features, 128)
    mu_range = 1.0 / math.sqrt(in_features)

    weight_mu = jax.random.uniform(
        k_wmu, (out_features, in_features), jnp.float32, -mu_range, mu_range)
    weight_sigma = jnp.full((out_features, in_features),
                            std_init / math.sqrt(in_features), jnp.float32)
    bias_mu = jax.random.uniform(
        k_bmu, (out_features,), jnp.float32, -mu_range, mu_range)
    bias_sigma = jnp.full((out_features,),
                          std_init / math.sqrt(out_features), jnp.float32)

    def pad_out(a):  # zero-pad the out_features axis (axis 0)
        return jnp.pad(a, ((0, out_pad - out_features),) + ((0, 0),) * (a.ndim - 1))

    params = {
        "in_features": in_features,
        "out_features": out_features,
        # [IN, OUT_pad]: MXU-native RHS layout, streamed in weight_dtype.
        "weight_mu_t": pad_out(weight_mu).T.astype(weight_dtype),
        "weight_sigma_t": pad_out(weight_sigma).T.astype(weight_dtype),
        # lane-dense [1, OUT_pad] f32 rows, added post-matmul.
        "bias_mu": pad_out(bias_mu).reshape(1, out_pad),
        "bias_sigma": pad_out(bias_sigma).reshape(1, out_pad),
    }
    return reset_noise(k_noise, params)


# ---------------------------------------------------------------------------
# Pure-JAX reference (same stored params, f32 math, full-precision dots)
# ---------------------------------------------------------------------------
def _reference(x, p, training):
    w_mu = p["weight_mu_t"].astype(jnp.float32)
    if training:
        w_sig = p["weight_sigma_t"].astype(jnp.float32)
        w_eps = p["eps_in"].reshape(-1, 1) * p["eps_out"].reshape(1, -1)
        w = w_mu + w_sig * w_eps
        b = p["bias_mu"] + p["bias_sigma"] * p["eps_out"]
    else:
        w, b = w_mu, p["bias_mu"]
    y = jax.lax.dot_general(x, w, (((1,), (0,)), ((), ())),
                            precision=jax.lax.Precision.HIGHEST) + b
    return y[:, :p["out_features"]]


if __name__ == "__main__":
    key = jax.random.PRNGKey(0)
    k_p1, k_x1, k_p2, k_x2, k_p3 = jax.random.split(key, 5)

    # Small, unaligned shapes (OUT 64 -> padded once at init to one 128 tile).
    B, IN, OUT = 8, 32, 64
    params = init_noisy_linear(k_p1, IN, OUT)                 # bf16 weights
    x = jax.random.normal(k_x1, (B, IN), dtype=jnp.float32)
    y_train = noisy_linear_forward(x, params, training=True)
    y_eval = noisy_linear_forward(x, params, training=False)

    # Aligned shapes: OUT_pad=512 -> TN=256, 2 "parallel" grid steps.
    B2, IN2, OUT2 = 16, 256, 512
    params2 = init_noisy_linear(k_p2, IN2, OUT2)              # bf16 weights
    x2 = jax.random.normal(k_x2, (B2, IN2), dtype=jnp.float32)
    y2_train = noisy_linear_forward(x2, params2, training=True)

    # f32-weight variant for a tight numerical check of the factored math.
    params3 = init_noisy_linear(k_p3, IN2, OUT2, weight_dtype=jnp.float32)
    y3_train = noisy_linear_forward(x2, params3, training=True)
    y3_eval = noisy_linear_forward(x2, params3, training=False)

    jax.block_until_ready((y_train, y_eval, y2_train, y3_train, y3_eval))

    assert y_train.shape == (B, OUT) and y_eval.shape == (B, OUT)
    assert y2_train.shape == (B2, OUT2)
    # bf16 weight streams: compare against f32 math on the same stored params.
    assert jnp.allclose(y_train, _reference(x, params, True), atol=3e-2, rtol=3e-2)
    assert jnp.allclose(y_eval, _reference(x, params, False), atol=3e-2, rtol=3e-2)
    assert jnp.allclose(y2_train, _reference(x2, params2, True), atol=3e-2, rtol=3e-2)
    # f32 weights: tight tolerance validates the factored-noise formulation.
    assert jnp.allclose(y3_train, _reference(x2, params3, True), atol=1e-3, rtol=1e-3)
    assert jnp.allclose(y3_eval, _reference(x2, params3, False), atol=1e-3, rtol=1e-3)

    print("KERNEL_OK")
</pallas_src>

<mosaic_0001>
module attributes {stable_mosaic.version = 11 : i64} {
  func.func @_noisy_linear_train_kernel(%arg0: i32, %arg1: memref<8x32xf32, #tpu.memory_space<vmem>>, %arg2: memref<32x128xbf16, #tpu.memory_space<vmem>>, %arg3: memref<32x128xbf16, #tpu.memory_space<vmem>>, %arg4: memref<1x32xf32, #tpu.memory_space<vmem>>, %arg5: memref<1x128xf32, #tpu.memory_space<vmem>>, %arg6: memref<1x128xf32, #tpu.memory_space<vmem>>, %arg7: memref<1x128xf32, #tpu.memory_space<vmem>>, %arg8: memref<8x128xf32, #tpu.memory_space<vmem>>) attributes {dimension_semantics = [#tpu.dimension_semantics<parallel>], iteration_bounds = array<i64: 1>, scalar_prefetch = 0 : i64, scratch_operands = 0 : i64, tpu.core_type = #tpu.core_type<tc>, window_params = [{pipeline_mode = #tpu.pipeline_mode<synchronous>, transform_indices = @transform_0, window_bounds = array<i64: 8, 32>}, {transform_indices = @transform_1, window_bounds = array<i64: 32, 128>}, {transform_indices = @transform_2, window_bounds = array<i64: 32, 128>}, {pipeline_mode = #tpu.pipeline_mode<synchronous>, transform_indices = @transform_3, window_bounds = array<i64: 1, 32>}, {transform_indices = @transform_4, window_bounds = array<i64: 1, 128>}, {transform_indices = @transform_5, window_bounds = array<i64: 1, 128>}, {transform_indices = @transform_6, window_bounds = array<i64: 1, 128>}, {transform_indices = @transform_7, window_bounds = array<i64: 8, 128>}]} {
    %c0 = arith.constant 0 : index
    %c0_0 = arith.constant 0 : index
    %0 = vector.load %arg1[%c0, %c0_0] : memref<8x32xf32, #tpu.memory_space<vmem>>, vector<8x32xf32>
    %c0_1 = arith.constant 0 : index
    %c0_2 = arith.constant 0 : index
    %1 = vector.load %arg5[%c0_1, %c0_2] : memref<1x128xf32, #tpu.memory_space<vmem>>, vector<1x128xf32>
    %2 = arith.truncf %0 : vector<8x32xf32> to vector<8x32xbf16>
    %c0_3 = arith.constant 0 : index
    %c0_4 = arith.constant 0 : index
    %3 = vector.load %arg2[%c0_3, %c0_4] : memref<32x128xbf16, #tpu.memory_space<vmem>>, vector<32x128xbf16>
    %cst = arith.constant dense<0.000000e+00> : vector<8x128xf32>
    %4 = tpu.matmul %2, %3, %cst {dimension_numbers = #tpu.dot_dimension_numbers<[1], [0], [0], [1], [0, 0, 1, 1], [], []>} : vector<8x32xbf16>, vector<32x128xbf16>, vector<8x128xf32> -> vector<8x128xf32>
    %c0_5 = arith.constant 0 : index
    %c0_6 = arith.constant 0 : index
    %5 = vector.load %arg4[%c0_5, %c0_6] : memref<1x32xf32, #tpu.memory_space<vmem>>, vector<1x32xf32>
    %6 = vector.broadcast %5 : vector<1x32xf32> to vector<8x32xf32>
    %7 = arith.mulf %0, %6 : vector<8x32xf32>
    %8 = arith.truncf %7 : vector<8x32xf32> to vector<8x32xbf16>
    %c0_7 = arith.constant 0 : index
    %c0_8 = arith.constant 0 : index
    %9 = vector.load %arg3[%c0_7, %c0_8] : memref<32x128xbf16, #tpu.memory_space<vmem>>, vector<32x128xbf16>
    %cst_9 = arith.constant dense<0.000000e+00> : vector<8x128xf32>
    %10 = tpu.matmul %8, %9, %cst_9 {dimension_numbers = #tpu.dot_dimension_numbers<[1], [0], [0], [1], [0, 0, 1, 1], [], []>} : vector<8x32xbf16>, vector<32x128xbf16>, vector<8x128xf32> -> vector<8x128xf32>
    %11 = vector.broadcast %1 : vector<1x128xf32> to vector<8x128xf32>
    %12 = arith.mulf %11, %10 : vector<8x128xf32>
    %13 = arith.addf %4, %12 : vector<8x128xf32>
    %c0_10 = arith.constant 0 : index
    %c0_11 = arith.constant 0 : index
    %14 = vector.load %arg6[%c0_10, %c0_11] : memref<1x128xf32, #tpu.memory_space<vmem>>, vector<1x128xf32>
    %c0_12 = arith.constant 0 : index
    %c0_13 = arith.constant 0 : index
    %15 = vector.load %arg7[%c0_12, %c0_13] : memref<1x128xf32, #tpu.memory_space<vmem>>, vector<1x128xf32>
    %16 = arith.mulf %15, %1 : vector<1x128xf32>
    %17 = arith.addf %14, %16 : vector<1x128xf32>
    %18 = vector.broadcast %17 : vector<1x128xf32> to vector<8x128xf32>
    %19 = arith.addf %13, %18 : vector<8x128xf32>
    %c0_14 = arith.constant 0 : index
    %c0_15 = arith.constant 0 : index
    %20 = vector.load %arg8[%c0_14, %c0_15] : memref<8x128xf32, #tpu.memory_space<vmem>>, vector<8x128xf32>
    tpu.vector_store %arg8[%c0_14, %c0_15], %19 {strides = array<i32>} : memref<8x128xf32, #tpu.memory_space<vmem>>, vector<8x128xf32>,
    return
  }
  func.func @transform_0(%arg0: i32) -> (i32, i32) {
    %c0_i32 = arith.constant 0 : i32
    %c0_i32_0 = arith.constant 0 : i32
    %c0_i32_1 = arith.constant 0 : i32
    return %c0_i32, %c0_i32_0 : i32, i32
  }
  func.func @transform_1(%arg0: i32) -> (i32, i32) {
    %c0_i32 = arith.constant 0 : i32
    %c0_i32_0 = arith.constant 0 : i32
    return %c0_i32, %arg0 : i32, i32
  }
  func.func @transform_2(%arg0: i32) -> (i32, i32) {
    %c0_i32 = arith.constant 0 : i32
    %c0_i32_0 = arith.constant 0 : i32
    return %c0_i32, %arg0 : i32, i32
  }
  func.func @transform_3(%arg0: i32) -> (i32, i32) {
    %c0_i32 = arith.constant 0 : i32
    %c0_i32_0 = arith.constant 0 : i32
    %c0_i32_1 = arith.constant 0 : i32
    return %c0_i32, %c0_i32_0 : i32, i32
  }
  func.func @transform_4(%arg0: i32) -> (i32, i32) {
    %c0_i32 = arith.constant 0 : i32
    %c0_i32_0 = arith.constant 0 : i32
    return %c0_i32, %arg0 : i32, i32
  }
  func.func @transform_5(%arg0: i32) -> (i32, i32) {
    %c0_i32 = arith.constant 0 : i32
    %c0_i32_0 = arith.constant 0 : i32
    return %c0_i32, %arg0 : i32, i32
  }
  func.func @transform_6(%arg0: i32) -> (i32, i32) {
    %c0_i32 = arith.constant 0 : i32
    %c0_i32_0 = arith.constant 0 : i32
    return %c0_i32, %arg0 : i32, i32
  }
  func.func @transform_7(%arg0: i32) -> (i32, i32) {
    %c0_i32 = arith.constant 0 : i32
    %c0_i32_0 = arith.constant 0 : i32
    return %c0_i32, %arg0 : i32, i32
  }
}

</mosaic_0001>

<bundles_post_ra>
// kernel: tpu_custom_call.1
= control target key start
LH: loop header
LB: loop body
LE: loop exit
PB: predicated region body
PF: predicated region fallthrough
CT: control target
= control target key end

     0   :  { %12 = vsyncpa [#allocation3], 0  ;;  %s482_s0 = inlined_call_operand.hbm [shape: f32[8,32], index: 0, kind: input, shape index: {}]   ;;  %s483_s1 = inlined_call_operand.hbm [shape: bf16[32,128], index: 1, kind: input, shape index: {}]   ;;  %s484_s2 = inlined_call_operand.hbm [shape: bf16[32,128], index: 2, kind: input, shape index: {}]   ;;  %s485_s3 = inlined_call_operand.vmem [shape: f32[1,32], index: 3, kind: input, shape index: {}]   ;;  %s486_s4 = inlined_call_operand.vmem [shape: f32[1,128], index: 4, kind: input, shape index: {}]   ;;  %s487_s5 = inlined_call_operand.vmem [shape: f32[1,128], index: 5, kind: input, shape index: {}]   ;;  %s488_s6 = inlined_call_operand.vmem [shape: f32[1,128], index: 6, kind: input, shape index: {}]   ;;  %s489_s7 = inlined_call_operand.hbm [shape: f32[8,128], index: 7, kind: output, shape index: {}]  }
   0x1   :  { %13 = vsyncpa [#allocation6], 0 }
   0x2   :  { %14 = vsyncpa [#allocation4], 0  ;;  %s368_s24 = smov [#allocation5]   ;;  %s274_s28 = scalar_lea.hbm %s483_s1, 256 }
   0x3   :  { %s30_s25 = sshll.u32 %s368_s24, 4  ;;  %p275_p0 = scmp.ne.s32.totalorder %s483_s1, %s274_s28  ;;  %s31_s25 = int_to_ptr.vmem [resolvable:$true] %s30_s25 }
   0x4   :  { %p278_p1 = scmp.lt.u32.totalorder %s274_s28, %s483_s1 }
   0x6   :  { %p280_p2 = pnand %p278_p1, %p275_p0 }
   0x8   :  { %283 = shalt.err (!%p280_p2)
}
   0x9   :  { %s284_s10 = scalar_lea.vmem %s31_s25, 256  ;;  %p289_p4 = scmp.lt.s32.totalorder %s31_s25, %s31_s25 }
   0xa   :  { %p285_p3 = scmp.ne.s32.totalorder %s31_s25, %s284_s10  ;;  %p290_p5 = scmp.lt.s32.totalorder %s284_s10, %s284_s10 }
   0xc   :  { %p291_p6 = por %p290_p5, %p289_p4 }
   0xe   :  { %p292_p7 = pnand %p291_p6, %p285_p3 }
  0x10   :  { %295 = shalt.err (!%p292_p7)
}
  0x11   :  { %s369_s11 = smov 64   ;;  %s370_s12 = smov 4  }
  0x12   :  { %36 = dma.hbm_to_vmem [thread:$0]  %s483_s1, 256, %s31_s25, [#allocation6], %s369_s11, %s369_s11, %s370_s12  }
  0x13   :  { %s371_s15 = smov [#allocation2]   ;;  %s372_s17 = smov [#allocation7]  }
  0x14   :  { %s21_s16 = sshll.u32 %s371_s15, 4  ;;  %s42_s18 = sshll.u32 %s372_s17, 4  ;;  %s22_s16 = int_to_ptr.vmem [resolvable:$true] %s21_s16  ;;  %s43_s18 = int_to_ptr.vmem [resolvable:$true] %s42_s18 }
  0x15   :  { %s296_s21 = scalar_lea.hbm %s482_s0, 128 }
  0x16   :  { %p297_p8 = scmp.ne.s32.totalorder %s482_s0, %s296_s21  ;;  %p300_p9 = scmp.lt.u32.totalorder %s296_s21, %s482_s0 }
  0x18   :  { %p302_p10 = pnand %p300_p9, %p297_p8 }
  0x1a   :  { %305 = shalt.err (!%p302_p10)
}
  0x1b   :  { %s306_s1 = scalar_lea.vmem %s22_s16, 128  ;;  %p311_p12 = scmp.lt.s32.totalorder %s22_s16, %s22_s16 }
  0x1c   :  { %p307_p11 = scmp.ne.s32.totalorder %s22_s16, %s306_s1  ;;  %p312_p13 = scmp.lt.s32.totalorder %s306_s1, %s306_s1 }
  0x1e   :  { %p313_p0 = por %p312_p13, %p311_p12 }
  0x20   :  { %p314_p1 = pnand %p313_p0, %p307_p11 }
  0x22   :  { %317 = shalt.err (!%p314_p1)
}
  0x23   :  { %24 = dma.hbm_to_vmem [thread:$0]  %s482_s0, 128, %s22_s16, [#allocation3]  }
  0x24   :  { %s318_s30 = scalar_lea.hbm %s484_s2, 256 }
  0x25   :  { %p319_p2 = scmp.ne.s32.totalorder %s484_s2, %s318_s30  ;;  %p322_p3 = scmp.lt.u32.totalorder %s318_s30, %s484_s2 }
  0x27   :  { %p324_p4 = pnand %p322_p3, %p319_p2 }
  0x29   :  { %327 = shalt.err (!%p324_p4)
}
  0x2a   :  { %s328_s14 = scalar_lea.vmem %s43_s18, 256  ;;  %p333_p6 = scmp.lt.s32.totalorder %s43_s18, %s43_s18 }
  0x2b   :  { %p329_p5 = scmp.ne.s32.totalorder %s43_s18, %s328_s14  ;;  %p334_p7 = scmp.lt.s32.totalorder %s328_s14, %s328_s14 }
  0x2d   :  { %p335_p8 = por %p334_p7, %p333_p6 }
  0x2f   :  { %p336_p9 = pnand %p335_p8, %p329_p5 }
  0x31   :  { %339 = shalt.err (!%p336_p9)
}
  0x32   :  { %48 = dma.hbm_to_vmem [thread:$0]  %s484_s2, 256, %s43_s18, [#allocation6], %s369_s11, %s369_s11, %s370_s12  }
  0x33   :  { %362 = dma.done.wait [#allocation3], 128  }
  0x34   :  { %363 = vsyncadd [#allocation3], 4294967168 }
  0x35   :  { %364 = dma.done.wait [#allocation6], 512  }
  0x36   :  { %365 = vsyncadd [#allocation6], 4294966784  ;;  %v373_v0 = vmov 0.0   ;;  %vm374_vm0 = vmmov 0   ;;  %v270_v1 = vld [vmem:[#allocation7] sm:$0xff]   ;;  %v271_v2 = vld [vmem:[#allocation5] sm:$0xff]   ;;  %v144_v10 = vlaneseq }
  0x37   :  { %246 = vmatprep.subr.bf16.mxu0 %v373_v0  ;;  %254 = vmatprep.subr.bf16.mxu1 %v373_v0  ;;  %v272_v3 = vld [vmem:[#allocation7 + $0x8] sm:$0xff]   ;;  %v273_v4 = vld [vmem:[#allocation5 + $0x8] sm:$0xff]   ;;  %vm99_vm1 = vcmask 261120  }
  0x38   :  { %250 = vmatprep.mubr.msk.bf16.mxu0 %vm374_vm0, %v373_v0  ;;  %258 = vmatprep.mubr.msk.bf16.mxu1 %vm374_vm0, %v373_v0  ;;  %v67_v5 = vld [vmem:[#allocation2] sm:$0xff]  ;;  %v145_v11 = vshrl.u32 %v144_v10, 7 }
  0x39   :  { %247 = vmatpush3.bf16.msra.mxu0 %v270_v1  ;;  %255 = vmatpush3.bf16.msra.mxu1 %v271_v2  ;;  %v233_v6 = vld [vmem:[%s485_s3] ss:$0 sm:$0xff]  ;;  %v69_v8 = vpack.c.bf16 %v67_v5, %v67_v5 }
  0x3a   :  { %248 = vmatprep.subr.bf16.mxu0 %v373_v0  ;;  %256 = vmatprep.subr.bf16.mxu1 %v373_v0  ;;  %v81_v7 = vmul.f32 %v233_v6, %v67_v5  ;;  %v68_v12 = vld [vmem:[%s486_s4] sm:$0x1]  ;;  %v146_v14 = vsub.s32 0, %v145_v11  ;;  %s375_s4 = smov [#allocation8]  }
  0x3b   :  { %v206_v13 = vld [vmem:[%s488_s6] sm:$0x1]  ;;  %s223_s20 = sshll.u32 %s375_s4, 4  ;;  %s224_s20 = int_to_ptr.vmem [resolvable:$true] %s223_s20 }
  0x3c   :  { %v82_v9 = vpack.c.bf16 %v81_v7, %v81_v7  ;;  %v207_v15 = vmul.f32 %v206_v13, %v68_v12  ;;  %v205_v16 = vld [vmem:[%s487_s5] sm:$0x1]  ;;  %v147_v17 = vrot.slane %v68_v12, %v146_v14  ;;  %s340_s6 = scalar_lea.vmem %s224_s20, 128  ;;  %p345_p11 = scmp.lt.s32.totalorder %s224_s20, %s224_s20 }
  0x3d   :  { %249 = vmatpush3.bf16.msra.mxu0 %v272_v3  ;;  %257 = vmatpush3.bf16.msra.mxu1 %v273_v4  ;;  %p341_p10 = scmp.ne.s32.totalorder %s224_s20, %s340_s6  ;;  %p346_p12 = scmp.lt.s32.totalorder %s340_s6, %s340_s6 }
  0x3e   :  { %v208_v18 = vadd.f32 %v207_v15, %v205_v16 }
  0x3f   :  { %p347_p13 = por %p346_p12, %p345_p11 }
  0x40   :  { %251 = vmatmul.mubr.msk.bf16.vlgmr.msra.gmra.mrb[0].mxu0 %vm99_vm1, %v82_v9  ;;  %259 = vmatmul.mubr.msk.bf16.vlgmr.msra.gmra.mrb[0].mxu1 %vm99_vm1, %v69_v8  ;;  %v213_v22 = vrot.slane %v208_v18, %v146_v14 }
  0x41   :  { %p348_p0 = pnand %p347_p13, %p341_p10 }
 0x113   :  { %v137_v19 = vpop.f32.mrb[0].mxu0  ;;  %v199_v21 = vpop.f32.mrb[0].mxu1 }
 0x114   :  { %v149_v20 = vmul.f32 %v147_v17, %v137_v19  ;;  %v252_v23 = vpop.f32.mrb[1].mxu0  ;;  %v260_v24 = vpop.f32.mrb[1].mxu1 }
 0x115   :  { %v140_v25 = vpop.f32.mrb[2].mxu0  ;;  %v202_v27 = vpop.f32.mrb[2].mxu1 }
 0x116   :  { %v200_v26 = vadd.f32 %v199_v21, %v149_v20  ;;  %v253_v28 = vpop.f32.mrb[3].mxu0  ;;  %v261_v29 = vpop.f32.mrb[3].mxu1 }
 0x118   :  { %v215_v30 = vadd.f32 %v213_v22, %v200_v26 }
 0x11a   :  { %216 = vst [vmem:[#allocation8] sm:$0xff] %v215_v30 }
 0x11b   :  { %351 = shalt.err (!%p348_p0)
}
 0x11c   :  { %s352_s22 = scalar_lea.hbm %s489_s7, 128 }
 0x11d   :  { %p353_p1 = scmp.ne.s32.totalorder %s489_s7, %s352_s22  ;;  %p356_p2 = scmp.lt.u32.totalorder %s352_s22, %s489_s7 }
 0x11f   :  { %p358_p3 = pnand %p356_p2, %p353_p1 }
 0x121   :  { %361 = shalt.err (!%p358_p3)
}
 0x122   :  { %226 = dma.vmem_to_hbm [thread:$0]  %s224_s20, 128, %s489_s7, [#allocation4]  }
 0x123   :  { %366 = dma.done.wait [#allocation4], 128  }
 0x124   :  { %367 = vsyncadd [#allocation4], 4294967168 }
 0x125   :  { %230 = vsyncpa [#allocation3], 1 }
 0x126   :  { %231 = vsyncpa [#allocation6], 1 }
 0x127   :  { %232 = vsyncpa [#allocation4], 1 }

</bundles_post_ra>
